<compile_context>
chip_gen: v7x
topology: tpu7x:2x2x1
jax: 0.10.0
libtpu: 0.0.40
codegen_flags: <defaults>
</compile_context>

<pallas_src>
import functools

import jax
import jax.numpy as jnp
from jax.experimental import pallas as pl
from jax.experimental.pallas import tpu as pltpu


H1_PAD = 128   # hidden 1, padded from 120
H2_PAD = 128   # hidden 2, padded from 84
A_PAD = 128    # action (output lane) dim, padded from n_actions


def _round_up(x, m):
    return (x + m - 1) // m * m


def qnetwork_kernel(x_ref, w1_ref, b1_ref, w2_ref, b2_ref, w3_ref, b3_ref, o_ref):
    # Layer 1: (TB, K) @ (K, 128) on the MXU -> f32 accumulator; bias + ReLU in f32.
    h1 = jnp.dot(x_ref[...], w1_ref[...], preferred_element_type=jnp.float32)
    h1 = jnp.maximum(h1 + b1_ref[...], 0.0)
    # Layer 2: downcast activations to bf16 for the MXU, accumulate in f32.
    h2 = jnp.dot(h1.astype(w2_ref.dtype), w2_ref[...],
                 preferred_element_type=jnp.float32)
    h2 = jnp.maximum(h2 + b2_ref[...], 0.0)
    # Output layer (no activation). Padded Q columns are exactly 0 because the
    # corresponding weight columns / bias entries are zero-padded.
    q = jnp.dot(h2.astype(w3_ref.dtype), w3_ref[...],
                preferred_element_type=jnp.float32)
    o_ref[...] = (q + b3_ref[...]).astype(o_ref.dtype)


@functools.partial(jax.jit, static_argnames=("n_actions", "tb"))
def qnetwork_forward(x, params, *, n_actions, tb=256):
    """Full MLP forward in a single Pallas kernel, batch-tiled over a 1-D grid."""
    w1, b1, w2, b2, w3, b3 = params
    batch, obs_dim = x.shape
    obs_pad = w1.shape[0]

    # Cast the activation stream to the weights' dtype (bf16) and pad K.
    x = x.astype(w1.dtype)
    if obs_pad != obs_dim:
        x = jnp.pad(x, ((0, 0), (0, obs_pad - obs_dim)))

    # Batch tile: at least 8 sublanes, at most `tb`; pad batch to a multiple.
    tb_eff = min(tb, _round_up(batch, 8))
    b_pad = _round_up(batch, tb_eff)
    if b_pad != batch:
        x = jnp.pad(x, ((0, b_pad - batch), (0, 0)))

    grid = (b_pad // tb_eff,)

    def tiled(shape):       # streamed per grid step (double-buffered)
        return pl.BlockSpec(shape, lambda i: (i, 0))

    def resident(shape):    # constant index map -> stays VMEM-resident
        return pl.BlockSpec(shape, lambda i: (0, 0))

    flops = 2 * b_pad * (obs_pad * H1_PAD + H1_PAD * H2_PAD + H2_PAD * A_PAD)
    bytes_accessed = (
        x.size * x.dtype.itemsize
        + sum(int(p.size) * p.dtype.itemsize for p in params)
        + b_pad * A_PAD * 4
    )

    q = pl.pallas_call(
        qnetwork_kernel,
        out_shape=jax.ShapeDtypeStruct((b_pad, A_PAD), jnp.float32),
        grid=grid,
        in_specs=[
            tiled((tb_eff, obs_pad)),
            resident(w1.shape), resident(b1.shape),
            resident(w2.shape), resident(b2.shape),
            resident(w3.shape), resident(b3.shape),
        ],
        out_specs=tiled((tb_eff, A_PAD)),
        compiler_params=pltpu.CompilerParams(
            dimension_semantics=("parallel",)),
        cost_estimate=pl.CostEstimate(
            flops=flops, transcendentals=0, bytes_accessed=bytes_accessed),
    )(x, w1, b1, w2, b2, w3, b3)

    return q[:batch, :n_actions]


def init_params(key, obs_dim, n_actions, weight_dtype=jnp.bfloat16):
    """PyTorch nn.Linear default init (U[-1/sqrt(fan_in), 1/sqrt(fan_in)]).

    Weights are stored transposed as (in_features, out_features), zero-padded
    to lane-aligned shapes and cast to bf16:
        W1: (obs_pad, 128), W2: (128, 128), W3: (128, 128)
    Biases stay f32, shape (1, 128), zero-padded.
    """
    obs_pad = _round_up(obs_dim, 8)
    dims = [(obs_dim, obs_pad, 120, H1_PAD),
            (120, H1_PAD, 84, H2_PAD),
            (84, H2_PAD, n_actions, A_PAD)]
    params = []
    for fan_in, in_pad, fan_out, out_pad in dims:
        key, kw, kb = jax.random.split(key, 3)
        bound = 1.0 / jnp.sqrt(jnp.float32(fan_in))
        w = jax.random.uniform(kw, (fan_in, fan_out), jnp.float32, -bound, bound)
        b = jax.random.uniform(kb, (1, fan_out), jnp.float32, -bound, bound)
        w = jnp.pad(w, ((0, in_pad - fan_in), (0, out_pad - fan_out)))
        b = jnp.pad(b, ((0, 0), (0, out_pad - fan_out)))
        params += [w.astype(weight_dtype), b]
    return tuple(params)


def reference_forward(x, params, n_actions):
    """Pure-JAX reference mirroring the kernel's numerics (bf16 matmul inputs,
    f32 accumulation) — same Linear/ReLU semantics as the PyTorch module."""
    w1, b1, w2, b2, w3, b3 = params
    f32 = jnp.float32
    obs_pad = w1.shape[0]
    xb = x.astype(w1.dtype)
    xb = jnp.pad(xb, ((0, 0), (0, obs_pad - xb.shape[1])))
    h1 = jnp.maximum(xb.astype(f32) @ w1.astype(f32) + b1, 0.0)
    h1 = h1.astype(w2.dtype).astype(f32)
    h2 = jnp.maximum(h1 @ w2.astype(f32) + b2, 0.0)
    h2 = h2.astype(w3.dtype).astype(f32)
    q = h2 @ w3.astype(f32) + b3
    return q[:, :n_actions]


if __name__ == "__main__":
    batch = 2
    obs_dim = 16       # env.single_observation_space.shape -> prod = 16
    n_actions = 4      # env.single_action_space.n

    key = jax.random.PRNGKey(0)
    key, kx = jax.random.split(key)
    x = jax.random.normal(kx, (batch, obs_dim), jnp.float32)
    params = init_params(key, obs_dim, n_actions)

    q = qnetwork_forward(x, params, n_actions=n_actions)
    q = jax.block_until_ready(q)

    q_ref = reference_forward(x, params, n_actions)
    assert q.shape == (batch, n_actions)
    assert jnp.allclose(q, q_ref, atol=1e-4, rtol=1e-4), (q, q_ref)

    print("KERNEL_OK")
</pallas_src>

<mosaic_0001>
module attributes {stable_mosaic.version = 11 : i64} {
  func.func @qnetwork_kernel(%arg0: i32, %arg1: memref<8x16xbf16, #tpu.memory_space<vmem>>, %arg2: memref<16x128xbf16, #tpu.memory_space<vmem>>, %arg3: memref<1x128xf32, #tpu.memory_space<vmem>>, %arg4: memref<128x128xbf16, #tpu.memory_space<vmem>>, %arg5: memref<1x128xf32, #tpu.memory_space<vmem>>, %arg6: memref<128x128xbf16, #tpu.memory_space<vmem>>, %arg7: memref<1x128xf32, #tpu.memory_space<vmem>>, %arg8: memref<8x128xf32, #tpu.memory_space<vmem>>) attributes {dimension_semantics = [#tpu.dimension_semantics<parallel>], iteration_bounds = array<i64: 1>, scalar_prefetch = 0 : i64, scratch_operands = 0 : i64, tpu.core_type = #tpu.core_type<tc>, window_params = [{transform_indices = @transform_0, window_bounds = array<i64: 8, 16>}, {pipeline_mode = #tpu.pipeline_mode<synchronous>, transform_indices = @transform_1, window_bounds = array<i64: 16, 128>}, {pipeline_mode = #tpu.pipeline_mode<synchronous>, transform_indices = @transform_2, window_bounds = array<i64: 1, 128>}, {pipeline_mode = #tpu.pipeline_mode<synchronous>, transform_indices = @transform_3, window_bounds = array<i64: 128, 128>}, {pipeline_mode = #tpu.pipeline_mode<synchronous>, transform_indices = @transform_4, window_bounds = array<i64: 1, 128>}, {pipeline_mode = #tpu.pipeline_mode<synchronous>, transform_indices = @transform_5, window_bounds = array<i64: 128, 128>}, {pipeline_mode = #tpu.pipeline_mode<synchronous>, transform_indices = @transform_6, window_bounds = array<i64: 1, 128>}, {transform_indices = @transform_7, window_bounds = array<i64: 8, 128>}]} {
    %c0 = arith.constant 0 : index
    %c0_0 = arith.constant 0 : index
    %0 = vector.load %arg1[%c0, %c0_0] : memref<8x16xbf16, #tpu.memory_space<vmem>>, vector<8x16xbf16>
    %c0_1 = arith.constant 0 : index
    %c0_2 = arith.constant 0 : index
    %1 = vector.load %arg2[%c0_1, %c0_2] : memref<16x128xbf16, #tpu.memory_space<vmem>>, vector<16x128xbf16>
    %cst = arith.constant dense<0.000000e+00> : vector<8x128xf32>
    %2 = tpu.matmul %0, %1, %cst {dimension_numbers = #tpu.dot_dimension_numbers<[1], [0], [0], [1], [0, 0, 1, 1], [], []>} : vector<8x16xbf16>, vector<16x128xbf16>, vector<8x128xf32> -> vector<8x128xf32>
    %c0_3 = arith.constant 0 : index
    %c0_4 = arith.constant 0 : index
    %3 = vector.load %arg3[%c0_3, %c0_4] : memref<1x128xf32, #tpu.memory_space<vmem>>, vector<1x128xf32>
    %4 = vector.broadcast %3 : vector<1x128xf32> to vector<8x128xf32>
    %5 = arith.addf %2, %4 : vector<8x128xf32>
    %cst_5 = arith.constant 0.000000e+00 : f32
    %6 = vector.broadcast %cst_5 : f32 to vector<8x128xf32>
    %7 = arith.maximumf %5, %6 : vector<8x128xf32>
    %8 = arith.truncf %7 : vector<8x128xf32> to vector<8x128xbf16>
    %c0_6 = arith.constant 0 : index
    %c0_7 = arith.constant 0 : index
    %9 = vector.load %arg4[%c0_6, %c0_7] : memref<128x128xbf16, #tpu.memory_space<vmem>>, vector<128x128xbf16>
    %cst_8 = arith.constant dense<0.000000e+00> : vector<8x128xf32>
    %10 = tpu.matmul %8, %9, %cst_8 {dimension_numbers = #tpu.dot_dimension_numbers<[1], [0], [0], [1], [0, 0, 1, 1], [], []>} : vector<8x128xbf16>, vector<128x128xbf16>, vector<8x128xf32> -> vector<8x128xf32>
    %c0_9 = arith.constant 0 : index
    %c0_10 = arith.constant 0 : index
    %11 = vector.load %arg5[%c0_9, %c0_10] : memref<1x128xf32, #tpu.memory_space<vmem>>, vector<1x128xf32>
    %12 = vector.broadcast %11 : vector<1x128xf32> to vector<8x128xf32>
    %13 = arith.addf %10, %12 : vector<8x128xf32>
    %cst_11 = arith.constant 0.000000e+00 : f32
    %14 = vector.broadcast %cst_11 : f32 to vector<8x128xf32>
    %15 = arith.maximumf %13, %14 : vector<8x128xf32>
    %16 = arith.truncf %15 : vector<8x128xf32> to vector<8x128xbf16>
    %c0_12 = arith.constant 0 : index
    %c0_13 = arith.constant 0 : index
    %17 = vector.load %arg6[%c0_12, %c0_13] : memref<128x128xbf16, #tpu.memory_space<vmem>>, vector<128x128xbf16>
    %cst_14 = arith.constant dense<0.000000e+00> : vector<8x128xf32>
    %18 = tpu.matmul %16, %17, %cst_14 {dimension_numbers = #tpu.dot_dimension_numbers<[1], [0], [0], [1], [0, 0, 1, 1], [], []>} : vector<8x128xbf16>, vector<128x128xbf16>, vector<8x128xf32> -> vector<8x128xf32>
    %c0_15 = arith.constant 0 : index
    %c0_16 = arith.constant 0 : index
    %19 = vector.load %arg7[%c0_15, %c0_16] : memref<1x128xf32, #tpu.memory_space<vmem>>, vector<1x128xf32>
    %20 = vector.broadcast %19 : vector<1x128xf32> to vector<8x128xf32>
    %21 = arith.addf %18, %20 : vector<8x128xf32>
    %c0_17 = arith.constant 0 : index
    %c0_18 = arith.constant 0 : index
    %22 = vector.load %arg8[%c0_17, %c0_18] : memref<8x128xf32, #tpu.memory_space<vmem>>, vector<8x128xf32>
    tpu.vector_store %arg8[%c0_17, %c0_18], %21 {strides = array<i32>} : memref<8x128xf32, #tpu.memory_space<vmem>>, vector<8x128xf32>,
    return
  }
  func.func @transform_0(%arg0: i32) -> (i32, i32) {
    %c0_i32 = arith.constant 0 : i32
    %c0_i32_0 = arith.constant 0 : i32
    return %arg0, %c0_i32 : i32, i32
  }
  func.func @transform_1(%arg0: i32) -> (i32, i32) {
    %c0_i32 = arith.constant 0 : i32
    %c0_i32_0 = arith.constant 0 : i32
    %c0_i32_1 = arith.constant 0 : i32
    return %c0_i32, %c0_i32_0 : i32, i32
  }
  func.func @transform_2(%arg0: i32) -> (i32, i32) {
    %c0_i32 = arith.constant 0 : i32
    %c0_i32_0 = arith.constant 0 : i32
    %c0_i32_1 = arith.constant 0 : i32
    return %c0_i32, %c0_i32_0 : i32, i32
  }
  func.func @transform_3(%arg0: i32) -> (i32, i32) {
    %c0_i32 = arith.constant 0 : i32
    %c0_i32_0 = arith.constant 0 : i32
    %c0_i32_1 = arith.constant 0 : i32
    return %c0_i32, %c0_i32_0 : i32, i32
  }
  func.func @transform_4(%arg0: i32) -> (i32, i32) {
    %c0_i32 = arith.constant 0 : i32
    %c0_i32_0 = arith.constant 0 : i32
    %c0_i32_1 = arith.constant 0 : i32
    return %c0_i32, %c0_i32_0 : i32, i32
  }
  func.func @transform_5(%arg0: i32) -> (i32, i32) {
    %c0_i32 = arith.constant 0 : i32
    %c0_i32_0 = arith.constant 0 : i32
    %c0_i32_1 = arith.constant 0 : i32
    return %c0_i32, %c0_i32_0 : i32, i32
  }
  func.func @transform_6(%arg0: i32) -> (i32, i32) {
    %c0_i32 = arith.constant 0 : i32
    %c0_i32_0 = arith.constant 0 : i32
    %c0_i32_1 = arith.constant 0 : i32
    return %c0_i32, %c0_i32_0 : i32, i32
  }
  func.func @transform_7(%arg0: i32) -> (i32, i32) {
    %c0_i32 = arith.constant 0 : i32
    %c0_i32_0 = arith.constant 0 : i32
    return %arg0, %c0_i32 : i32, i32
  }
}

</mosaic_0001>

<bundles_post_ra>
// kernel: qnetwork_forward.1
= control target key start
LH: loop header
LB: loop body
LE: loop exit
PB: predicated region body
PF: predicated region fallthrough
CT: control target
= control target key end

     0   :  { %12 = vsyncpa [#allocation3], 0  ;;  %s614_s0 = inlined_call_operand.vmem [shape: bf16[8,16], index: 0, kind: input, shape index: {}]   ;;  %s615_s1 = inlined_call_operand.vmem [shape: bf16[16,128], index: 1, kind: input, shape index: {}]   ;;  %s616_s2 = inlined_call_operand.vmem [shape: f32[1,128], index: 2, kind: input, shape index: {}]   ;;  %s617_s3 = inlined_call_operand.hbm [shape: bf16[128,128], index: 3, kind: input, shape index: {}]   ;;  %s618_s4 = inlined_call_operand.vmem [shape: f32[1,128], index: 4, kind: input, shape index: {}]   ;;  %s619_s5 = inlined_call_operand.hbm [shape: bf16[128,128], index: 5, kind: input, shape index: {}]   ;;  %s620_s6 = inlined_call_operand.vmem [shape: f32[1,128], index: 6, kind: input, shape index: {}]   ;;  %s621_s7 = inlined_call_operand.vmem [shape: f32[8,128], index: 7, kind: output, shape index: {}]  }
   0x1   :  { %13 = vsyncpa [#allocation5], 0  ;;  %s506_s24 = smov [#allocation2]   ;;  %s458_s28 = scalar_lea.hbm %s617_s3, 1024 }
   0x2   :  { %s25_s25 = sshll.u32 %s506_s24, 4  ;;  %p459_p0 = scmp.ne.s32.totalorder %s617_s3, %s458_s28  ;;  %s26_s25 = int_to_ptr.vmem [resolvable:$true] %s25_s25 }
   0x3   :  { %p462_p1 = scmp.lt.u32.totalorder %s458_s28, %s617_s3 }
   0x5   :  { %p464_p2 = pnand %p462_p1, %p459_p0 }
   0x7   :  { %467 = shalt.err (!%p464_p2)
}
   0x8   :  { %s468_s10 = scalar_lea.vmem %s26_s25, 1024  ;;  %p473_p4 = scmp.lt.s32.totalorder %s26_s25, %s26_s25 }
   0x9   :  { %p469_p3 = scmp.ne.s32.totalorder %s26_s25, %s468_s10  ;;  %p474_p5 = scmp.lt.s32.totalorder %s468_s10, %s468_s10 }
   0xb   :  { %p475_p6 = por %p474_p5, %p473_p4 }
   0xd   :  { %p476_p7 = pnand %p475_p6, %p469_p3 }
   0xf   :  { %479 = shalt.err (!%p476_p7)
}
  0x10   :  { %s507_s11 = smov 64   ;;  %s508_s12 = smov 4  }
  0x11   :  { %31 = dma.hbm_to_vmem [thread:$0]  %s617_s3, 1024, %s26_s25, [#allocation3], %s507_s11, %s507_s11, %s508_s12  }
  0x12   :  { %s509_s15 = smov [#allocation4]   ;;  %s480_s19 = scalar_lea.hbm %s619_s5, 1024 }
  0x13   :  { %s39_s16 = sshll.u32 %s509_s15, 4  ;;  %p481_p8 = scmp.ne.s32.totalorder %s619_s5, %s480_s19  ;;  %s40_s16 = int_to_ptr.vmem [resolvable:$true] %s39_s16 }
  0x14   :  { %p484_p9 = scmp.lt.u32.totalorder %s480_s19, %s619_s5 }
  0x16   :  { %p486_p10 = pnand %p484_p9, %p481_p8 }
  0x18   :  { %489 = shalt.err (!%p486_p10)
}
  0x19   :  { %s490_s24 = scalar_lea.vmem %s40_s16, 1024  ;;  %p495_p12 = scmp.lt.s32.totalorder %s40_s16, %s40_s16 }
  0x1a   :  { %p491_p11 = scmp.ne.s32.totalorder %s40_s16, %s490_s24  ;;  %p496_p13 = scmp.lt.s32.totalorder %s490_s24, %s490_s24 }
  0x1c   :  { %p497_p0 = por %p496_p13, %p495_p12 }
  0x1e   :  { %p498_p1 = pnand %p497_p0, %p491_p11 }
  0x20   :  { %501 = shalt.err (!%p498_p1)
}
  0x21   :  { %45 = dma.hbm_to_vmem [thread:$0]  %s619_s5, 1024, %s40_s16, [#allocation5], %s507_s11, %s507_s11, %s508_s12  }
  0x22   :  { %502 = dma.done.wait [#allocation3], 1024  }
  0x23   :  { %503 = vsyncadd [#allocation3], 4294966272 }
  0x24   :  { %504 = dma.done.wait [#allocation5], 1024  }
  0x25   :  { %505 = vsyncadd [#allocation5], 4294966272  ;;  %v510_v0 = vmov 0.0   ;;  %vm511_vm0 = vmmov 0   ;;  %v441_v1 = vld [vmem:[%s615_s1] sm:$0xff]   ;;  %vm71_vm1 = vcmask 130048  }
  0x26   :  { %389 = vmatprep.subr.bf16.mxu0 %v510_v0  ;;  %391 = vmatprep.mubr.msk.bf16.mxu0 %vm511_vm0, %v510_v0  ;;  %v55_v2 = vld [vmem:[%s614_s0] sm:$0xf]  ;;  %v442_v3 = vld [vmem:[#allocation2] sm:$0xff]   ;;  %v443_v4 = vld [vmem:[#allocation2 + $0x8] sm:$0xff]  }
  0x27   :  { %395 = vmatprep.subr.bf16.mxu1 %v510_v0  ;;  %411 = vmatprep.mubr.msk.bf16.mxu1 %vm511_vm0, %v510_v0  ;;  %v444_v5 = vld [vmem:[#allocation2 + $0x10] sm:$0xff]   ;;  %v445_v6 = vld [vmem:[#allocation2 + $0x18] sm:$0xff]   ;;  %v446_v7 = vld [vmem:[#allocation2 + $0x20] sm:$0xff]  }
  0x28   :  { %390 = vmatpush3.bf16.msra.mxu0 %v441_v1  ;;  %396 = vmatpush3.bf16.msra.mxu1 %v442_v3  ;;  %v447_v8 = vld [vmem:[#allocation2 + $0x28] sm:$0xff]   ;;  %v448_v9 = vld [vmem:[#allocation2 + $0x30] sm:$0xff]   ;;  %v449_v10 = vld [vmem:[#allocation2 + $0x38] sm:$0xff]  }
  0x29   :  { %415 = vmatprep.subr.bf16.mxu0 %v510_v0  ;;  %397 = vmatprep.subr.bf16.mxu1 %v510_v0  ;;  %v450_v11 = vld [vmem:[#allocation4] sm:$0xff]   ;;  %v451_v12 = vld [vmem:[#allocation4 + $0x8] sm:$0xff]   ;;  %v452_v13 = vld [vmem:[#allocation4 + $0x10] sm:$0xff]  }
  0x2a   :  { %v453_v14 = vld [vmem:[#allocation4 + $0x18] sm:$0xff]   ;;  %v454_v15 = vld [vmem:[#allocation4 + $0x20] sm:$0xff]   ;;  %v455_v16 = vld [vmem:[#allocation4 + $0x28] sm:$0xff]  }
  0x2b   :  { %392 = vmatmul.mubr.msk.bf16.vlgmr.msra.gmra.mrb[0].mxu0 %vm71_vm1, %v55_v2  ;;  %v348_v17 = vld [vmem:[%s616_s2] ss:$0 sm:$0xff]  ;;  %v456_v25 = vld [vmem:[#allocation4 + $0x30] sm:$0xff]  }
  0x2c   :  { %431 = vmatprep.mubr.msk.bf16.mxu0 %vm511_vm0, %v510_v0  ;;  %398 = vmatpush3.bf16.msra.mxu1 %v443_v4  ;;  %v457_v26 = vld [vmem:[#allocation4 + $0x38] sm:$0xff]  }
  0x2d   :  { %399 = vmatprep.subr.bf16.mxu1 %v510_v0  ;;  %416 = vmatpush3.bf16.msra.mxu0 %v450_v11  ;;  %v351_v27 = vld [vmem:[%s618_s4] ss:$0 sm:$0xff] }
  0x2e   :  { %417 = vmatprep.subr.bf16.mxu0 %v510_v0  ;;  %v360_v35 = vld [vmem:[%s620_s6] ss:$0 sm:$0xff] }
  0x30   :  { %400 = vmatpush3.bf16.msra.mxu1 %v444_v5 }
  0x31   :  { %401 = vmatprep.subr.bf16.mxu1 %v510_v0  ;;  %418 = vmatpush3.bf16.msra.mxu0 %v451_v12 }
  0x32   :  { %419 = vmatprep.subr.bf16.mxu0 %v510_v0 }
  0x34   :  { %402 = vmatpush3.bf16.msra.mxu1 %v445_v6 }
  0x35   :  { %403 = vmatprep.subr.bf16.mxu1 %v510_v0  ;;  %420 = vmatpush3.bf16.msra.mxu0 %v452_v13 }
  0x36   :  { %421 = vmatprep.subr.bf16.mxu0 %v510_v0 }
  0x38   :  { %404 = vmatpush3.bf16.msra.mxu1 %v446_v7 }
  0x39   :  { %405 = vmatprep.subr.bf16.mxu1 %v510_v0  ;;  %422 = vmatpush3.bf16.msra.mxu0 %v453_v14 }
  0x3a   :  { %423 = vmatprep.subr.bf16.mxu0 %v510_v0 }
  0x3c   :  { %406 = vmatpush3.bf16.msra.mxu1 %v447_v8 }
  0x3d   :  { %407 = vmatprep.subr.bf16.mxu1 %v510_v0  ;;  %424 = vmatpush3.bf16.msra.mxu0 %v454_v15 }
  0x3e   :  { %425 = vmatprep.subr.bf16.mxu0 %v510_v0 }
  0x40   :  { %408 = vmatpush3.bf16.msra.mxu1 %v448_v9 }
  0x41   :  { %409 = vmatprep.subr.bf16.mxu1 %v510_v0  ;;  %426 = vmatpush3.bf16.msra.mxu0 %v455_v16 }
  0x42   :  { %427 = vmatprep.subr.bf16.mxu0 %v510_v0 }
  0x44   :  { %410 = vmatpush3.bf16.msra.mxu1 %v449_v10 }
  0x45   :  { %428 = vmatpush3.bf16.msra.mxu0 %v456_v25 }
  0x46   :  { %429 = vmatprep.subr.bf16.mxu0 %v510_v0 }
  0x49   :  { %430 = vmatpush3.bf16.msra.mxu0 %v457_v26 }
  0xfe   :  { %v109_v18 = vpop.f32.mrb[0].mxu0 }
  0xff   :  { %v110_v19 = vadd.f32 %v348_v17, %v109_v18  ;;  %v393_v20 = vpop.f32.mrb[1].mxu0 }
 0x100   :  { %v112_v21 = vpop.f32.mrb[2].mxu0 }
 0x101   :  { %v115_v22 = vmax.f32 %v110_v19, 0.0  ;;  %v394_v23 = vpop.f32.mrb[3].mxu0 }
 0x103   :  { %v116_v24 = vpack.c.bf16 %v115_v22, %v115_v22 }
 0x105   :  { %412 = vmatmul.mubr.bf16.vlgmr.msra.gmra.mrb[0].mxu1 %v116_v24 }
 0x1d8   :  { %v222_v28 = vpop.f32.mrb[0].mxu1 }
 0x1d9   :  { %v223_v29 = vadd.f32 %v351_v27, %v222_v28  ;;  %v413_v30 = vpop.f32.mrb[1].mxu1 }
 0x1da   :  { %v225_v31 = vpop.f32.mrb[2].mxu1 }
 0x1db   :  { %v228_v32 = vmax.f32 %v223_v29, 0.0  ;;  %v414_v33 = vpop.f32.mrb[3].mxu1 }
 0x1dd   :  { %v229_v34 = vpack.c.bf16 %v228_v32, %v228_v32 }
 0x1df   :  { %432 = vmatmul.mubr.bf16.vlgmr.msra.gmra.mrb[4].mxu0 %v229_v34 }
 0x2b2   :  { %v335_v36 = vpop.f32.mrb[4].mxu0 }
 0x2b3   :  { %v336_v37 = vadd.f32 %v360_v35, %v335_v36  ;;  %v433_v38 = vpop.f32.mrb[5].mxu0 }
 0x2b4   :  { %v338_v39 = vpop.f32.mrb[6].mxu0 }
 0x2b5   :  { %341 = vst [vmem:[%s621_s7] sm:$0xff] %v336_v37  ;;  %v434_v40 = vpop.f32.mrb[7].mxu0 }
 0x2b6   :  { %346 = vsyncpa [#allocation3], 1 }
 0x2b7   :  { %347 = vsyncpa [#allocation5], 1 }

</bundles_post_ra>
